<compile_context>
chip_gen: v5e
topology: v5e:2x2
jax: 0.10.0
libtpu: 0.0.40
codegen_flags: <defaults>
</compile_context>

<pallas_src>
import functools

import jax
import jax.numpy as jnp
from jax.experimental import pallas as pl
from jax.experimental.pallas import tpu as pltpu

LANE = 128


def actor_kernel(x_ref, w1_ref, b1_ref, w2_ref, b2_ref, w3_ref, b3_ref, o_ref):
    # --- linear1 + relu ---  (bf16 operands, f32 accumulation on the MXU)
    h1 = jnp.dot(x_ref[...], w1_ref[...], preferred_element_type=jnp.float32)
    h1 = jnp.maximum(h1 + b1_ref[...], 0.0)              # b1 (1,128) broadcasts

    # --- linear2 + relu ---  (no VMEM staging: stays in vregs, one bf16 cast)
    h2 = jnp.dot(h1.astype(jnp.bfloat16), w2_ref[...],
                 preferred_element_type=jnp.float32)
    h2 = jnp.maximum(h2 + b2_ref[...], 0.0)               # b2 (1,256)

    # --- linear3 + softmax over the (lane-padded) last axis ---
    logits = jnp.dot(h2.astype(jnp.bfloat16), w3_ref[...],
                     preferred_element_type=jnp.float32)
    # Keep logits in f32: pad lanes carry -1e30 (would become -inf/NaN in bf16).
    logits = logits + b3_ref[...]
    m = jnp.max(logits, axis=-1, keepdims=True)
    e = jnp.exp(logits - m)                                # pad lanes -> 0
    denom = jnp.sum(e, axis=-1, keepdims=True)
    o_ref[...] = (e / denom).astype(o_ref.dtype)           # exact divide


def prepare_params(params):
    """One-time preprocessing: bf16 weights, lane-padded layer-3, -1e30 pad bias.

    Returns (prepped_param_dict, action_dim).  Call once; reuse across calls.
    """
    w1, b1 = params["w1"], params["b1"]
    w2, b2 = params["w2"], params["b2"]
    w3, b3 = params["w3"], params["b3"]
    action_dim = w3.shape[1]
    n_pad = pl.cdiv(action_dim, LANE) * LANE

    w3p = jnp.zeros((w3.shape[0], n_pad), jnp.bfloat16)
    w3p = w3p.at[:, :action_dim].set(w3.astype(jnp.bfloat16))
    # Pad logits get bias -1e30 -> softmax probability exactly 0 (logits stay f32).
    b3p = jnp.full((1, n_pad), -1e30, jnp.float32)
    b3p = b3p.at[:, :action_dim].set(b3.astype(jnp.float32))

    prepped = {
        "w1": w1.astype(jnp.bfloat16),
        "b1": b1.astype(jnp.float32).reshape(1, -1),
        "w2": w2.astype(jnp.bfloat16),
        "b2": b2.astype(jnp.float32).reshape(1, -1),
        "w3": w3p,
        "b3": b3p,
    }
    return prepped, action_dim


def _choose_batch_tile(batch, tb_max):
    """Tile = multiple of 16 (bf16 vreg packing); aim for >=2 grid steps when
    the batch allows so the 'parallel' axis can shard across v7x's 2 TCs."""
    b16 = ((batch + 15) // 16) * 16
    half = ((b16 + 1) // 2 + 15) // 16 * 16
    tb = max(16, min(tb_max, half))
    b_pad = ((b16 + tb - 1) // tb) * tb
    return tb, b_pad


@functools.partial(jax.jit, static_argnames=("action_dim", "tb_max"))
def actor_forward(x, prepped, action_dim, tb_max=256):
    """x: [batch, state_dim] float32. prepped: output of prepare_params."""
    w1, b1 = prepped["w1"], prepped["b1"]
    w2, b2 = prepped["w2"], prepped["b2"]
    w3, b3 = prepped["w3"], prepped["b3"]

    batch, state_dim = x.shape
    h1_dim, h2_dim = w1.shape[1], w2.shape[1]            # 128, 256
    n_pad = w3.shape[1]

    tb, b_pad = _choose_batch_tile(batch, tb_max)
    grid = (b_pad // tb,)

    # Pad only the batch axis of the streamed input; K stays at state_dim
    # (full-dim last-axis block is legal and avoids 4x extra HBM traffic).
    xp = jnp.zeros((b_pad, state_dim), jnp.bfloat16)
    xp = xp.at[:batch, :].set(x.astype(jnp.bfloat16))

    resident = lambda shape: pl.BlockSpec(shape, lambda i: (0, 0))

    out = pl.pallas_call(
        actor_kernel,
        out_shape=jax.ShapeDtypeStruct((b_pad, n_pad), jnp.float32),
        grid_spec=pltpu.PrefetchScalarGridSpec(
            num_scalar_prefetch=0,
            grid=grid,
            in_specs=[
                pl.BlockSpec((tb, state_dim), lambda i: (i, 0)),   # x streams
                resident((state_dim, h1_dim)), resident((1, h1_dim)),
                resident((h1_dim, h2_dim)), resident((1, h2_dim)),
                resident((h2_dim, n_pad)), resident((1, n_pad)),
            ],
            out_specs=pl.BlockSpec((tb, n_pad), lambda i: (i, 0)),
        ),
        compiler_params=pltpu.CompilerParams(
            dimension_semantics=("parallel",)),   # 2-TC sharding on v7x
    )(xp, w1, b1, w2, b2, w3, b3)

    return out[:batch, :action_dim]


def init_params(key, state_dim, action_dim):
    """Deterministic synthetic init mimicking nn.Linear's uniform(-1/sqrt(fan_in), ...)."""
    ks = jax.random.split(key, 6)

    def lin(kw, kb, fan_in, fan_out):
        bound = 1.0 / jnp.sqrt(fan_in)
        w = jax.random.uniform(kw, (fan_in, fan_out), jnp.float32, -bound, bound)
        b = jax.random.uniform(kb, (1, fan_out), jnp.float32, -bound, bound)
        return w, b

    w1, b1 = lin(ks[0], ks[1], state_dim, 128)
    w2, b2 = lin(ks[2], ks[3], 128, 256)
    w3, b3 = lin(ks[4], ks[5], 256, action_dim)
    return {"w1": w1, "b1": b1, "w2": w2, "b2": b2, "w3": w3, "b3": b3}


if __name__ == "__main__":
    key = jax.random.PRNGKey(0)
    k_x, k_p = jax.random.split(key)

    batch, state_dim, action_dim = 8, 32, 8
    x = jax.random.normal(k_x, (batch, state_dim), dtype=jnp.float32)
    params = init_params(k_p, state_dim, action_dim)

    prepped, adim = prepare_params(params)          # one-time weight prep
    prepped = jax.block_until_ready(prepped)

    out = actor_forward(x, prepped, action_dim=adim)
    out = jax.block_until_ready(out)

    assert out.shape == (batch, action_dim)
    # exact softmax normalization -> rows sum to 1 within f32 rounding
    assert jnp.allclose(jnp.sum(out, axis=-1), 1.0, atol=1e-5)

    # reference with the same bf16-weight / f32-accumulate recipe
    bf = jnp.bfloat16
    h1 = jnp.maximum(
        jnp.dot(x.astype(bf), params["w1"].astype(bf),
                preferred_element_type=jnp.float32) + params["b1"], 0.0)
    h2 = jnp.maximum(
        jnp.dot(h1.astype(bf), params["w2"].astype(bf),
                preferred_element_type=jnp.float32) + params["b2"], 0.0)
    logits = jnp.dot(h2.astype(bf), params["w3"].astype(bf),
                     preferred_element_type=jnp.float32) + params["b3"]
    ref_bf16 = jax.nn.softmax(logits, axis=-1)
    assert jnp.allclose(out, ref_bf16, atol=5e-3)

    # loose sanity check vs the pure-f32 PyTorch-equivalent math
    # (bf16 matmul operands are an accepted numerics deviation from the f32 module)
    h1f = jnp.maximum(x @ params["w1"] + params["b1"], 0.0)
    h2f = jnp.maximum(h1f @ params["w2"] + params["b2"], 0.0)
    ref_f32 = jax.nn.softmax(h2f @ params["w3"] + params["b3"], axis=-1)
    assert jnp.allclose(out, ref_f32, atol=5e-2)

    print("KERNEL_OK")
</pallas_src>

<mosaic_0001>
module attributes {stable_mosaic.version = 11 : i64} {
  func.func @actor_kernel(%arg0: i32, %arg1: memref<16x32xbf16, #tpu.memory_space<vmem>>, %arg2: memref<32x128xbf16, #tpu.memory_space<vmem>>, %arg3: memref<1x128xf32, #tpu.memory_space<vmem>>, %arg4: memref<128x256xbf16, #tpu.memory_space<vmem>>, %arg5: memref<1x256xf32, #tpu.memory_space<vmem>>, %arg6: memref<256x128xbf16, #tpu.memory_space<vmem>>, %arg7: memref<1x128xf32, #tpu.memory_space<vmem>>, %arg8: memref<16x128xf32, #tpu.memory_space<vmem>>) attributes {dimension_semantics = [#tpu.dimension_semantics<parallel>], iteration_bounds = array<i64: 1>, scalar_prefetch = 0 : i64, scratch_operands = 0 : i64, tpu.core_type = #tpu.core_type<tc>, window_params = [{transform_indices = @transform_0, window_bounds = array<i64: 16, 32>}, {pipeline_mode = #tpu.pipeline_mode<synchronous>, transform_indices = @transform_1, window_bounds = array<i64: 32, 128>}, {pipeline_mode = #tpu.pipeline_mode<synchronous>, transform_indices = @transform_2, window_bounds = array<i64: 1, 128>}, {pipeline_mode = #tpu.pipeline_mode<synchronous>, transform_indices = @transform_3, window_bounds = array<i64: 128, 256>}, {pipeline_mode = #tpu.pipeline_mode<synchronous>, transform_indices = @transform_4, window_bounds = array<i64: 1, 256>}, {pipeline_mode = #tpu.pipeline_mode<synchronous>, transform_indices = @transform_5, window_bounds = array<i64: 256, 128>}, {pipeline_mode = #tpu.pipeline_mode<synchronous>, transform_indices = @transform_6, window_bounds = array<i64: 1, 128>}, {transform_indices = @transform_7, window_bounds = array<i64: 16, 128>}]} {
    %c0 = arith.constant 0 : index
    %c0_0 = arith.constant 0 : index
    %0 = vector.load %arg1[%c0, %c0_0] : memref<16x32xbf16, #tpu.memory_space<vmem>>, vector<16x32xbf16>
    %c0_1 = arith.constant 0 : index
    %c0_2 = arith.constant 0 : index
    %1 = vector.load %arg2[%c0_1, %c0_2] : memref<32x128xbf16, #tpu.memory_space<vmem>>, vector<32x128xbf16>
    %cst = arith.constant dense<0.000000e+00> : vector<16x128xf32>
    %2 = tpu.matmul %0, %1, %cst {dimension_numbers = #tpu.dot_dimension_numbers<[1], [0], [0], [1], [0, 0, 1, 1], [], []>} : vector<16x32xbf16>, vector<32x128xbf16>, vector<16x128xf32> -> vector<16x128xf32>
    %c0_3 = arith.constant 0 : index
    %c0_4 = arith.constant 0 : index
    %3 = vector.load %arg3[%c0_3, %c0_4] : memref<1x128xf32, #tpu.memory_space<vmem>>, vector<1x128xf32>
    %4 = vector.broadcast %3 : vector<1x128xf32> to vector<16x128xf32>
    %5 = arith.addf %2, %4 : vector<16x128xf32>
    %cst_5 = arith.constant 0.000000e+00 : f32
    %6 = vector.broadcast %cst_5 : f32 to vector<16x128xf32>
    %7 = arith.maximumf %5, %6 : vector<16x128xf32>
    %8 = arith.truncf %7 : vector<16x128xf32> to vector<16x128xbf16>
    %c0_6 = arith.constant 0 : index
    %c0_7 = arith.constant 0 : index
    %9 = vector.load %arg4[%c0_6, %c0_7] : memref<128x256xbf16, #tpu.memory_space<vmem>>, vector<128x256xbf16>
    %cst_8 = arith.constant dense<0.000000e+00> : vector<16x256xf32>
    %10 = tpu.matmul %8, %9, %cst_8 {dimension_numbers = #tpu.dot_dimension_numbers<[1], [0], [0], [1], [0, 0, 1, 1], [], []>} : vector<16x128xbf16>, vector<128x256xbf16>, vector<16x256xf32> -> vector<16x256xf32>
    %c0_9 = arith.constant 0 : index
    %c0_10 = arith.constant 0 : index
    %11 = vector.load %arg5[%c0_9, %c0_10] : memref<1x256xf32, #tpu.memory_space<vmem>>, vector<1x256xf32>
    %12 = vector.broadcast %11 : vector<1x256xf32> to vector<16x256xf32>
    %13 = arith.addf %10, %12 : vector<16x256xf32>
    %cst_11 = arith.constant 0.000000e+00 : f32
    %14 = vector.broadcast %cst_11 : f32 to vector<16x256xf32>
    %15 = arith.maximumf %13, %14 : vector<16x256xf32>
    %16 = arith.truncf %15 : vector<16x256xf32> to vector<16x256xbf16>
    %c0_12 = arith.constant 0 : index
    %c0_13 = arith.constant 0 : index
    %17 = vector.load %arg6[%c0_12, %c0_13] : memref<256x128xbf16, #tpu.memory_space<vmem>>, vector<256x128xbf16>
    %cst_14 = arith.constant dense<0.000000e+00> : vector<16x128xf32>
    %18 = tpu.matmul %16, %17, %cst_14 {dimension_numbers = #tpu.dot_dimension_numbers<[1], [0], [0], [1], [0, 0, 1, 1], [], []>} : vector<16x256xbf16>, vector<256x128xbf16>, vector<16x128xf32> -> vector<16x128xf32>
    %c0_15 = arith.constant 0 : index
    %c0_16 = arith.constant 0 : index
    %19 = vector.load %arg7[%c0_15, %c0_16] : memref<1x128xf32, #tpu.memory_space<vmem>>, vector<1x128xf32>
    %20 = vector.broadcast %19 : vector<1x128xf32> to vector<16x128xf32>
    %21 = arith.addf %18, %20 : vector<16x128xf32>
    %cst_17 = arith.constant dense<0xFF800000> : vector<16xf32>
    %22 = vector.multi_reduction <maximumf>, %21, %cst_17 [1] : vector<16x128xf32> to vector<16xf32>
    %23 = vector.shape_cast %22 : vector<16xf32> to vector<16x1xf32>
    %24 = vector.broadcast %23 : vector<16x1xf32> to vector<16x128xf32>
    %25 = arith.subf %21, %24 : vector<16x128xf32>
    %26 = math.exp %25 : vector<16x128xf32>
    %cst_18 = arith.constant dense<0.000000e+00> : vector<16xf32>
    %27 = vector.multi_reduction <add>, %26, %cst_18 [1] : vector<16x128xf32> to vector<16xf32>
    %28 = vector.shape_cast %27 : vector<16xf32> to vector<16x1xf32>
    %29 = vector.broadcast %28 : vector<16x1xf32> to vector<16x128xf32>
    %30 = arith.divf %26, %29 : vector<16x128xf32>
    %c0_19 = arith.constant 0 : index
    %c0_20 = arith.constant 0 : index
    %31 = vector.load %arg8[%c0_19, %c0_20] : memref<16x128xf32, #tpu.memory_space<vmem>>, vector<16x128xf32>
    tpu.vector_store %arg8[%c0_19, %c0_20], %30 {strides = array<i32>} : memref<16x128xf32, #tpu.memory_space<vmem>>, vector<16x128xf32>,
    return
  }
  func.func @transform_0(%arg0: i32) -> (i32, i32) {
    %c0_i32 = arith.constant 0 : i32
    %c0_i32_0 = arith.constant 0 : i32
    return %arg0, %c0_i32 : i32, i32
  }
  func.func @transform_1(%arg0: i32) -> (i32, i32) {
    %c0_i32 = arith.constant 0 : i32
    %c0_i32_0 = arith.constant 0 : i32
    %c0_i32_1 = arith.constant 0 : i32
    return %c0_i32, %c0_i32_0 : i32, i32
  }
  func.func @transform_2(%arg0: i32) -> (i32, i32) {
    %c0_i32 = arith.constant 0 : i32
    %c0_i32_0 = arith.constant 0 : i32
    %c0_i32_1 = arith.constant 0 : i32
    return %c0_i32, %c0_i32_0 : i32, i32
  }
  func.func @transform_3(%arg0: i32) -> (i32, i32) {
    %c0_i32 = arith.constant 0 : i32
    %c0_i32_0 = arith.constant 0 : i32
    %c0_i32_1 = arith.constant 0 : i32
    return %c0_i32, %c0_i32_0 : i32, i32
  }
  func.func @transform_4(%arg0: i32) -> (i32, i32) {
    %c0_i32 = arith.constant 0 : i32
    %c0_i32_0 = arith.constant 0 : i32
    %c0_i32_1 = arith.constant 0 : i32
    return %c0_i32, %c0_i32_0 : i32, i32
  }
  func.func @transform_5(%arg0: i32) -> (i32, i32) {
    %c0_i32 = arith.constant 0 : i32
    %c0_i32_0 = arith.constant 0 : i32
    %c0_i32_1 = arith.constant 0 : i32
    return %c0_i32, %c0_i32_0 : i32, i32
  }
  func.func @transform_6(%arg0: i32) -> (i32, i32) {
    %c0_i32 = arith.constant 0 : i32
    %c0_i32_0 = arith.constant 0 : i32
    %c0_i32_1 = arith.constant 0 : i32
    return %c0_i32, %c0_i32_0 : i32, i32
  }
  func.func @transform_7(%arg0: i32) -> (i32, i32) {
    %c0_i32 = arith.constant 0 : i32
    %c0_i32_0 = arith.constant 0 : i32
    return %arg0, %c0_i32 : i32, i32
  }
}

</mosaic_0001>

<bundles_post_ra>
// kernel: actor_forward.1
= control target key start
LH: loop header
LB: loop body
LE: loop exit
PB: predicated region body
PF: predicated region fallthrough
CT: control target
= control target key end

     0   :  { %12 = vsyncpa [#allocation3], 0  ;;  %s775_s0 = inlined_call_operand.vmem [shape: bf16[16,32], index: 0, kind: input, shape index: {}]   ;;  %s776_s1 = inlined_call_operand.vmem [shape: bf16[32,128], index: 1, kind: input, shape index: {}]   ;;  %s777_s2 = inlined_call_operand.vmem [shape: f32[1,128], index: 2, kind: input, shape index: {}]   ;;  %s778_s3 = inlined_call_operand.hbm [shape: bf16[128,256], index: 3, kind: input, shape index: {}]   ;;  %s779_s4 = inlined_call_operand.vmem [shape: f32[1,256], index: 4, kind: input, shape index: {}]   ;;  %s780_s5 = inlined_call_operand.hbm [shape: bf16[256,128], index: 5, kind: input, shape index: {}]   ;;  %s781_s6 = inlined_call_operand.vmem [shape: f32[1,128], index: 6, kind: input, shape index: {}]   ;;  %s782_s7 = inlined_call_operand.vmem [shape: f32[16,128], index: 7, kind: output, shape index: {}]  }
   0x1   :  { %s24_s26 = sshll.u32 %s778_s3, 4  ;;  %s25_s26 = int_to_ptr.hbm [resolvable:$true] %s24_s26 }
   0x2   :  { %13 = vsyncpa [#allocation5], 0  ;;  %s699_s27 = smov [#allocation2]   ;;  %s39_s8 = sshll.u32 %s780_s5, 4  ;;  %s40_s8 = int_to_ptr.hbm [resolvable:$true] %s39_s8 }
   0x3   :  { %s26_s28 = sshll.u32 %s699_s27, 4  ;;  %s700_s9 = smov 128   ;;  %s27_s28 = int_to_ptr.vmem [resolvable:$true] %s26_s28 }
   0x4   :  { %s701_s10 = smov 8   ;;  %s702_s11 = smov [#allocation4]  }
   0x5   :  { %32 = dma.hbm_to_vmem [thread:$0]  %s25_s26, 2048, %s27_s28, [#allocation3], %s700_s9, %s700_s9, %s701_s10  }
   0x6   :  { %s41_s12 = sshll.u32 %s702_s11, 4  ;;  %s703_s13 = smov 64   ;;  %s42_s12 = int_to_ptr.vmem [resolvable:$true] %s41_s12 }
   0x7   :  { %s704_s14 = smov 4  }
   0x8   :  { %47 = dma.hbm_to_vmem [thread:$0]  %s40_s8, 2048, %s42_s12, [#allocation5], %s703_s13, %s703_s13, %s704_s14  }
   0x9   :  { %695 = dma.done.wait [#allocation3], 2048  }
   0xa   :  { %696 = vsyncadd [#allocation3], 4294965248 }
   0xb   :  { %697 = dma.done.wait [#allocation5], 2048  }
   0xc   :  { %698 = vsyncadd [#allocation5], 4294965248  ;;  %v598_v0 = vld [vmem:[%s776_s1 + $0x8] sm:$0xff]  ;;  %v597_v1 = vld [vmem:[%s776_s1] sm:$0xff]  ;;  %vm86_vm0 = vcmask 261120  }
   0xd   :  { %v526_v2 = vld [vmem:[#allocation2 + $0x70] sm:$0xf]  ;;  %v614_v3 = vld [vmem:[#allocation2 + $0x74] sm:$0xf0]  ;;  %v613_v4 = vld [vmem:[#allocation2 + $0x74] sm:$0xf]  ;;  %96 = vmatpush.bf16.msra.mxu0 %v598_v0 }
   0xe   :  { %v527_v5 = vor.u32 %v614_v3, %v526_v2  ;;  %v528_v6 = vld [vmem:[#allocation2 + $0x78] sm:$0xf0]  ;;  %v518_v7 = vld [vmem:[#allocation2 + $0x60] sm:$0xf]  ;;  %v612_v8 = vld [vmem:[#allocation2 + $0x64] sm:$0xf0] }
   0xf   :  { %v531_v9 = vor.u32 %v613_v4, %v528_v6  ;;  %v611_v10 = vld [vmem:[#allocation2 + $0x64] sm:$0xf]  ;;  %v520_v11 = vld [vmem:[#allocation2 + $0x68] sm:$0xf0]  ;;  %v519_v12 = vor.u32 %v612_v8, %v518_v7  ;;  %v510_v15 = vld [vmem:[#allocation2 + $0x50] sm:$0xf] }
  0x10   :  { %209 = vmatpush.bf16.msra.mxu1 %v527_v5  ;;  %v596_v13 = vld [vmem:[%s775_s0] sm:$0xff]  ;;  %v523_v14 = vor.u32 %v611_v10, %v520_v11  ;;  %v610_v16 = vld [vmem:[#allocation2 + $0x54] sm:$0xf0]  ;;  %v609_v17 = vld [vmem:[#allocation2 + $0x54] sm:$0xf] }
  0x11   :  { %223 = vmatpush.bf16.msra.mxu2 %v531_v9  ;;  %97 = vmatpush.bf16.msra.mxu0 %v597_v1  ;;  %v512_v18 = vld [vmem:[#allocation2 + $0x58] sm:$0xf0]  ;;  %v511_v19 = vor.u32 %v610_v16, %v510_v15  ;;  %v502_v21 = vld [vmem:[#allocation2 + $0x40] sm:$0xf]  ;;  %v608_v22 = vld [vmem:[#allocation2 + $0x44] sm:$0xf0] }
  0x12   :  { %v515_v20 = vor.u32 %v609_v17, %v512_v18  ;;  %v607_v23 = vld [vmem:[#allocation2 + $0x44] sm:$0xf]  ;;  %v504_v24 = vld [vmem:[#allocation2 + $0x48] sm:$0xf0]  ;;  %v503_v25 = vor.u32 %v608_v22, %v502_v21  ;;  %v494_v27 = vld [vmem:[#allocation2 + $0x30] sm:$0xf] }
  0x13   :  { %v507_v26 = vor.u32 %v607_v23, %v504_v24  ;;  %v606_v28 = vld [vmem:[#allocation2 + $0x34] sm:$0xf0]  ;;  %v605_v29 = vld [vmem:[#allocation2 + $0x34] sm:$0xf]  ;;  %v496_v31 = vld [vmem:[#allocation2 + $0x38] sm:$0xf0] }
  0x14   :  { %210 = vmatpush.bf16.msra.mxu1 %v519_v12  ;;  %467 = vmatmul.msk.bf16.vlgmr.msra.gmra.mxu0 %vm86_vm0, %v596_v13  ;;  %v495_v30 = vor.u32 %v606_v28, %v494_v27  ;;  %v499_v32 = vor.u32 %v605_v29, %v496_v31  ;;  %v486_v33 = vld [vmem:[#allocation2 + $0x20] sm:$0xf]  ;;  %v604_v34 = vld [vmem:[#allocation2 + $0x24] sm:$0xf0]  ;;  %v603_v35 = vld [vmem:[#allocation2 + $0x24] sm:$0xf] }
  0x15   :  { %224 = vmatpush.bf16.msra.mxu2 %v523_v14  ;;  %v487_v36 = vor.u32 %v604_v34, %v486_v33  ;;  %v488_v37 = vld [vmem:[#allocation2 + $0x28] sm:$0xf0]  ;;  %v478_v39 = vld [vmem:[#allocation2 + $0x10] sm:$0xf]  ;;  %v602_v40 = vld [vmem:[#allocation2 + $0x14] sm:$0xf0] }
  0x16   :  { %v491_v38 = vor.u32 %v603_v35, %v488_v37  ;;  %v601_v41 = vld [vmem:[#allocation2 + $0x14] sm:$0xf]  ;;  %v479_v42 = vor.u32 %v602_v40, %v478_v39  ;;  %v480_v43 = vld [vmem:[#allocation2 + $0x18] sm:$0xf0]  ;;  %v470_v45 = vld [vmem:[#allocation2] sm:$0xf] }
  0x17   :  { %v483_v44 = vor.u32 %v601_v41, %v480_v43  ;;  %v600_v46 = vld [vmem:[#allocation2 + $0x4] sm:$0xf0]  ;;  %v599_v47 = vld [vmem:[#allocation2 + $0x4] sm:$0xf]  ;;  %v472_v49 = vld [vmem:[#allocation2 + $0x8] sm:$0xf0] }
  0x18   :  { %211 = vmatpush.bf16.msra.mxu1 %v511_v19  ;;  %v471_v48 = vor.u32 %v600_v46, %v470_v45  ;;  %v475_v50 = vor.u32 %v599_v47, %v472_v49  ;;  %v622_v51 = vld [vmem:[#allocation4 + $0x38] sm:$0xff]  ;;  %v621_v53 = vld [vmem:[#allocation4 + $0x30] sm:$0xff]  ;;  %v620_v55 = vld [vmem:[#allocation4 + $0x28] sm:$0xff] }
  0x19   :  { %225 = vmatpush.bf16.msra.mxu2 %v515_v20  ;;  %v630_v52 = vld [vmem:[#allocation4 + $0x78] sm:$0xff]  ;;  %375 = vmatpush.bf16.msra.mxu3 %v622_v51  ;;  %v629_v54 = vld [vmem:[#allocation4 + $0x70] sm:$0xff]  ;;  %v628_v56 = vld [vmem:[#allocation4 + $0x68] sm:$0xff] }
  0x1a   :  { %389 = vmatpush.bf16.msrb.mxu0 %v630_v52  ;;  %v619_v57 = vld [vmem:[#allocation4 + $0x20] sm:$0xff]  ;;  %v618_v2 = vld [vmem:[#allocation4 + $0x18] sm:$0xff]  ;;  %v617_v4 = vld [vmem:[#allocation4 + $0x10] sm:$0xff] }
  0x1b   :  { %v637_v59 = vld [vmem:[%s777_s2] ss:$0 sm:$0xff]  ;;  %v626_v5 = vld [vmem:[#allocation4 + $0x58] sm:$0xff]  ;;  %v616_v6 = vld [vmem:[#allocation4 + $0x8] sm:$0xff] }
  0x1c   :  { %212 = vmatpush.bf16.msra.mxu1 %v503_v25  ;;  %v627_v3 = vld [vmem:[#allocation4 + $0x60] sm:$0xff]  ;;  %v625_v7 = vld [vmem:[#allocation4 + $0x50] sm:$0xff]  ;;  %v624_v9 = vld [vmem:[#allocation4 + $0x48] sm:$0xff] }
  0x1d   :  { %226 = vmatpush.bf16.msra.mxu2 %v507_v26  ;;  %376 = vmatpush.bf16.msra.mxu3 %v621_v53  ;;  %v615_v8 = vld [vmem:[#allocation4] sm:$0xff] }
  0x1e   :  { %390 = vmatpush.bf16.msrb.mxu0 %v629_v54  ;;  %v623_v10 = vld [vmem:[#allocation4 + $0x40] sm:$0xff] }
  0x1f   :  { %v123_v11 = vld [vmem:[%s779_s4] sm:$0x3] }
  0x20   :  { %213 = vmatpush.bf16.msra.mxu1 %v495_v30  ;;  %v125_v13 = vperm.slane %v123_v11, 0  ;;  %v126_v17 = vperm.slane %v123_v11, 1  ;;  %v638_v28 = vld [vmem:[%s781_s6] ss:$0 sm:$0xff] }
  0x21   :  { %227 = vmatpush.bf16.msra.mxu2 %v499_v32  ;;  %377 = vmatpush.bf16.msra.mxu3 %v620_v55 }
  0x22   :  { %391 = vmatpush.bf16.msrb.mxu0 %v628_v56 }
  0x24   :  { %214 = vmatpush.bf16.msra.mxu1 %v487_v36 }
  0x25   :  { %228 = vmatpush.bf16.msra.mxu2 %v491_v38  ;;  %378 = vmatpush.bf16.msra.mxu3 %v619_v57 }
  0x26   :  { %392 = vmatpush.bf16.msrb.mxu0 %v627_v3 }
  0x28   :  { %215 = vmatpush.bf16.msra.mxu1 %v479_v42 }
  0x29   :  { %229 = vmatpush.bf16.msra.mxu2 %v483_v44  ;;  %379 = vmatpush.bf16.msra.mxu3 %v618_v2 }
  0x2a   :  { %393 = vmatpush.bf16.msrb.mxu0 %v626_v5 }
  0x2c   :  { %216 = vmatpush.bf16.msra.mxu1 %v471_v48 }
  0x2d   :  { %230 = vmatpush.bf16.msra.mxu2 %v475_v50  ;;  %380 = vmatpush.bf16.msra.mxu3 %v617_v4 }
  0x2e   :  { %394 = vmatpush.bf16.msrb.mxu0 %v625_v7 }
  0x31   :  { %381 = vmatpush.bf16.msra.mxu3 %v616_v6 }
  0x32   :  { %395 = vmatpush.bf16.msrb.mxu0 %v624_v9 }
  0x35   :  { %382 = vmatpush.bf16.msra.mxu3 %v615_v8 }
  0x36   :  { %396 = vmatpush.bf16.msrb.mxu0 %v623_v10 }
  0x91   :  { %v99_v58 = vpop.f32.mrf.mxu0 }
  0x92   :  { %v100_v60 = vadd.f32 %v637_v59, %v99_v58 }
  0x94   :  { %v104_v63 = vmax.f32 %v100_v60, 0.0 }
  0x99   :  { %v101_v61 = vpop.f32.mrf.mxu0 }
  0x9a   :  { %v102_v62 = vadd.f32 %v637_v59, %v101_v61 }
  0x9c   :  { %v105_v0 = vmax.f32 %v102_v62, 0.0 }
  0x9e   :  { %v106_v1 = vpack.c.bf16 %v105_v0, %v104_v63 }
  0xa0   :  { %217 = vmatmul.bf16.vlgmr.msra.gmra.mxu1 %v106_v1  ;;  %231 = vmatmul.bf16.vlgmr.msra.gmra.mxu2 %v106_v1 }
 0x11d   :  { %v218_v12 = vpop.f32.mrf.mxu1 }
 0x11e   :  { %v219_v15 = vadd.f32 %v218_v12, %v125_v13 }
 0x120   :  { %v237_v19 = vmax.f32 %v219_v15, 0.0 }
 0x123   :  { %v232_v14 = vpop.f32.mrf.mxu2 }
 0x124   :  { %v233_v21 = vadd.f32 %v232_v14, %v126_v17 }
 0x125   :  { %v220_v16 = vpop.f32.mrf.mxu1 }
 0x126   :  { %v221_v18 = vadd.f32 %v220_v16, %v125_v13  ;;  %v238_v25 = vmax.f32 %v233_v21, 0.0 }
 0x128   :  { %v239_v20 = vmax.f32 %v221_v18, 0.0 }
 0x12a   :  { %v241_v22 = vpack.c.bf16 %v239_v20, %v237_v19 }
 0x12b   :  { %v234_v23 = vpop.f32.mrf.mxu2 }
 0x12c   :  { %v235_v24 = vadd.f32 %v234_v23, %v126_v17  ;;  %383 = vmatmul.bf16.vlgmr.msra.gmra.mxu3 %v241_v22 }
 0x12e   :  { %v240_v26 = vmax.f32 %v235_v24, 0.0 }
 0x130   :  { %v242_v27 = vpack.c.bf16 %v240_v26, %v238_v25 }
 0x132   :  { %397 = vmatmul.bf16.vlgmr.msrb.gmra.mxu0 %v242_v27 }
 0x1af   :  { %v384_v29 = vpop.f32.mrf.mxu3  ;;  %v398_v30 = vpop.f32.mrf.mxu0 }
 0x1b0   :  { %v385_v31 = vadd.f32 %v638_v28, %v384_v29 }
 0x1b2   :  { %v399_v32 = vadd.f32 %v398_v30, %v385_v31 }
 0x1b4   :  { %403 = vmax.xlane.f32.xlu0 %v399_v32 }
 0x1b7   :  { %v386_v33 = vpop.f32.mrf.mxu3  ;;  %v400_v35 = vpop.f32.mrf.mxu0 }
 0x1b8   :  { %v387_v34 = vadd.f32 %v638_v28, %v386_v33 }
 0x1ba   :  { %v401_v36 = vadd.f32 %v400_v35, %v387_v34 }
 0x1bc   :  { %405 = vmax.xlane.f32.xlu0 %v401_v36 }
 0x227   :  { %v404_v37 = vpop.xlane.xlu0 %403 }
 0x228   :  { %v407_v38 = vsub.f32 %v399_v32, %v404_v37 }
 0x22a   :  { %v409_v39 = vmul.f32 1.442695, %v407_v38 }
 0x22c   :  { %639 = vpow2.f32 %v409_v39 }
 0x22f   :  { %v406_v40 = vpop.xlane.xlu0 %405 }
 0x230   :  { %v408_v41 = vsub.f32 %v401_v36, %v406_v40 }
 0x232   :  { %v640_v42 = vpop.eup %639  ;;  %v411_v43 = vmul.f32 1.442695, %v408_v41 }
 0x233   :  { %413 = vadd.xlane.f32.xlu1 %v640_v42 }
 0x234   :  { %641 = vpow2.f32 %v411_v43 }
 0x23a   :  { %v642_v44 = vpop.eup %641 }
 0x23b   :  { %415 = vadd.xlane.f32.xlu1 %v642_v44 }
 0x2a6   :  { %v414_v45 = vpop.xlane.xlu1 %413 }
 0x2a7   :  { %643 = vrcp.f32 %v414_v45  ;;  %v428_v50 = vand.u32 2147483648, %v414_v45  ;;  %v426_v52 = vand.u32 2147483647, %v414_v45  ;;  %vm422_vm2 = vweird.f32 %v414_v45 }
 0x2a9   :  { %v429_v55 = vor.u32 1.1754944e-38, %v428_v50  ;;  %vm427_vm4 = vcmp.eq.f32.partialorder %v426_v52, 8.507059e+37 }
 0x2ad   :  { %v644_v46 = vpop.eup %643 }
 0x2ae   :  { %v418_v47 = vmul.f32 %v644_v46, %v414_v45  ;;  %v416_v48 = vpop.xlane.xlu1 %415  ;;  %vm423_vm1 = vweird.f32 %v644_v46 }
 0x2af   :  { %645 = vrcp.f32 %v416_v48  ;;  %vm424_vm3 = vmor %vm422_vm2, %vm423_vm1  ;;  %v443_v61 = vand.u32 2147483648, %v416_v48  ;;  %v441_v63 = vand.u32 2147483647, %v416_v48  ;;  %vm437_vm6 = vweird.f32 %v416_v48 }
 0x2b0   :  { %v419_v49 = vsub.f32 1.0, %v418_v47 }
 0x2b1   :  { %v444_v1 = vor.u32 1.1754944e-38, %v443_v61  ;;  %vm442_vm8 = vcmp.eq.f32.partialorder %v441_v63, 8.507059e+37 }
 0x2b2   :  { %v420_v51 = vmul.f32 %v644_v46, %v419_v49 }
 0x2b4   :  { %v421_v53 = vadd.f32 %v644_v46, %v420_v51 }
 0x2b5   :  { %v646_v54 = vpop.eup %645 }
 0x2b6   :  { %v425_v56 = vsel %vm424_vm3, %v644_v46, %v421_v53  ;;  %v433_v57 = vmul.f32 %v646_v54, %v416_v48  ;;  %vm438_vm5 = vweird.f32 %v646_v54 }
 0x2b7   :  { %v430_v58 = vsel %vm427_vm4, %v429_v55, %v425_v56  ;;  %vm439_vm7 = vmor %vm437_vm6, %vm438_vm5 }
 0x2b8   :  { %v431_v59 = vmul.f32 %v640_v42, %v430_v58  ;;  %v434_v60 = vsub.f32 1.0, %v433_v57 }
 0x2ba   :  { %447 = vst [vmem:[%s782_s7] sm:$0xff] %v431_v59  ;;  %v435_v62 = vmul.f32 %v646_v54, %v434_v60 }
 0x2bc   :  { %v436_v0 = vadd.f32 %v646_v54, %v435_v62 }
 0x2be   :  { %v440_v2 = vsel %vm439_vm7, %v646_v54, %v436_v0 }
 0x2bf   :  { %v445_v3 = vsel %vm442_vm8, %v444_v1, %v440_v2 }
 0x2c0   :  { %v446_v4 = vmul.f32 %v642_v44, %v445_v3 }
 0x2c2   :  { %448 = vst [vmem:[%s782_s7 + $0x8] sm:$0xff] %v446_v4 }
 0x2c3   :  { %453 = vsyncpa [#allocation3], 1 }
 0x2c4   :  { %454 = vsyncpa [#allocation5], 1 }

</bundles_post_ra>
